<compile_context>
chip_gen: v6e
topology: v6e:2x2x1
jax: 0.10.0
libtpu: 0.0.40
codegen_flags: <defaults>
</compile_context>

<pallas_src>
import functools

import jax
import jax.numpy as jnp
import numpy as np
from jax.experimental import pallas as pl
from jax.experimental.pallas import tpu as pltpu


def _filter_kernel_separable(x_ref, o_ref, *, u, v, oh, lane_out, pre, post):
    """Rank-1 (separable) filter: row pass (lanes) then column pass (sublanes).

    x_ref: (H, LANE_IN)  packed input slab, LANE_IN = lane_out + KW - 1.
    o_ref: (OH, lane_out) packed output slab (lane-dense, multiple of 128).
    """
    x = pre(x_ref[...].astype(jnp.float32))

    # Row (lane-direction) pass: KW hoisted lane shifts, accumulate in place.
    tmp = None
    for j, vj in enumerate(v):
        term = vj * x[:, j:j + lane_out]
        tmp = term if tmp is None else tmp + term

    # Column (sublane-direction) pass: KH sublane shifts.
    acc = None
    for i, ui in enumerate(u):
        term = ui * tmp[i:i + oh, :]
        acc = term if acc is None else acc + term

    o_ref[...] = post(acc).astype(o_ref.dtype)


def _filter_kernel_general(x_ref, o_ref, *, coeffs, kh, kw, oh, lane_out,
                           pre, post):
    """General 2-D filter: lane shifts hoisted (<= KW), per-tap sublane slice."""
    x = pre(x_ref[...].astype(jnp.float32))

    # Hoist the lane shifts: one per filter column (skip all-zero columns).
    col_used = [any(coeffs[i][j] != 0.0 for i in range(kh)) for j in range(kw)]
    y = [x[:, j:j + lane_out] if col_used[j] else None for j in range(kw)]

    acc = None
    for i in range(kh):
        for j in range(kw):
            c = coeffs[i][j]
            if c == 0.0:
                continue  # strength-reduce zero taps (NaN/Inf propagation of
                          # zero-weight taps differs from the reference conv)
            term = c * y[j][i:i + oh, :]
            acc = term if acc is None else acc + term
    if acc is None:  # degenerate all-zero filter
        acc = jnp.zeros((oh, lane_out), jnp.float32)

    o_ref[...] = post(acc).astype(o_ref.dtype)


def filter_layer(x, filt, pre_filter_func=None, post_filter_func=None):
    """x: (N, 3, H, W); filt: fixed (KH, KW) non-trainable filter (concrete)."""
    pre = (lambda t: t) if pre_filter_func is None else pre_filter_func
    post = (lambda t: t) if post_filter_func is None else post_filter_func

    n, c, h, w = x.shape
    filt_np = np.asarray(filt, dtype=np.float32)
    kh, kw = filt_np.shape
    oh, ow = h - kh + 1, w - kw + 1

    # ---- lane-dense packed layout (wrapper-side layout plumbing) ----------
    # (N, C, H, W) -> (H, N*C*W): lane index = ((n*C + c)*W + w), slot width W.
    # A uniform lane shift by j then reads column (w+j) of the same image for
    # every valid output column (w < OW), so no cross-image contamination.
    lane_valid = n * c * w
    lane_out = max(128, -(-lane_valid // 128) * 128)   # dense store width
    lane_in = lane_out + kw - 1                        # room for lane shifts
    x2d = jnp.transpose(x, (2, 0, 1, 3)).reshape(h, lane_valid)
    x2d = jnp.pad(x2d, ((0, 0), (0, lane_in - lane_valid)))

    # ---- separability check (rank-1) at trace time -------------------------
    uu, ss, vt = np.linalg.svd(filt_np.astype(np.float64))
    s0 = float(ss[0]) if ss.size else 0.0
    sep_u = uu[:, 0] * np.sqrt(s0)
    sep_v = vt[0, :] * np.sqrt(s0)
    separable = np.allclose(np.outer(sep_u, sep_v), filt_np.astype(np.float64),
                            rtol=1e-6, atol=1e-7 * max(1.0, float(np.abs(filt_np).max())))

    if separable:
        kernel = functools.partial(
            _filter_kernel_separable,
            u=tuple(float(a) for a in sep_u),
            v=tuple(float(a) for a in sep_v),
            oh=oh, lane_out=lane_out, pre=pre, post=post)
        taps = kh + kw
    else:
        kernel = functools.partial(
            _filter_kernel_general,
            coeffs=tuple(tuple(float(a) for a in row) for row in filt_np),
            kh=kh, kw=kw, oh=oh, lane_out=lane_out, pre=pre, post=post)
        taps = kh * kw

    itemsize = jnp.dtype(x.dtype).itemsize
    flops = int(2 * taps * oh * lane_out)
    bytes_accessed = int((h * lane_in + oh * lane_out) * itemsize)

    out2d = pl.pallas_call(
        kernel,
        out_shape=jax.ShapeDtypeStruct((oh, lane_out), x.dtype),
        grid=(1,),  # whole problem in a single block: one DMA in, one out
        in_specs=[pl.BlockSpec((h, lane_in), lambda i: (0, 0))],
        out_specs=pl.BlockSpec((oh, lane_out), lambda i: (0, 0)),
        compiler_params=pltpu.CompilerParams(
            dimension_semantics=("arbitrary",)),
        cost_estimate=pl.CostEstimate(
            flops=flops, transcendentals=0, bytes_accessed=bytes_accessed),
    )(x2d)

    # Unpack: (OH, lane_out) -> (N, C, OH, OW)
    out = out2d[:, :lane_valid].reshape(oh, n, c, w)[..., :ow]
    return jnp.transpose(out, (1, 2, 0, 3))


def _reference(x, filt):
    """Pure-JAX reference: grouped (depthwise) conv, identical to nn.Conv2d
    with groups=3 and the filter tiled over the 3 channels."""
    weight = jnp.tile(filt[None, None, :, :], (3, 1, 1, 1))  # (O=3, I/g=1, KH, KW)
    return jax.lax.conv_general_dilated(
        x, weight, window_strides=(1, 1), padding="VALID",
        dimension_numbers=("NCHW", "OIHW", "NCHW"), feature_group_count=3)


if __name__ == "__main__":
    key = jax.random.PRNGKey(0)

    # Input: NCHW with 3 channels (the module's Conv2d has in/out_channels=3,
    # groups=3).  pre/post filter funcs: identity (module default for post).
    x = jax.random.normal(key, (2, 3, 16, 16), dtype=jnp.float32)

    # 1) Separable fixed filter (3x3 smoothing kernel) -> fast path.
    filt_sep = np.array([[1.0, 2.0, 1.0],
                         [2.0, 4.0, 2.0],
                         [1.0, 2.0, 1.0]], dtype=np.float32) / 16.0
    out = jax.block_until_ready(filter_layer(x, filt_sep))
    ref = _reference(x, jnp.asarray(filt_sep))
    assert out.shape == (2, 3, 14, 14), out.shape
    assert np.allclose(np.asarray(out), np.asarray(ref), atol=1e-5, rtol=1e-5)

    # 2) Non-separable filter (sharpen, rank 2, has zero taps) -> general path.
    filt_gen = np.array([[0.0, -1.0, 0.0],
                         [-1.0, 5.0, -1.0],
                         [0.0, -1.0, 0.0]], dtype=np.float32)
    out2 = jax.block_until_ready(filter_layer(x, filt_gen))
    ref2 = _reference(x, jnp.asarray(filt_gen))
    assert out2.shape == (2, 3, 14, 14), out2.shape
    assert np.allclose(np.asarray(out2), np.asarray(ref2), atol=1e-5, rtol=1e-5)

    print("KERNEL_OK")
</pallas_src>

<mosaic_0001>
module attributes {stable_mosaic.version = 11 : i64} {
  func.func @_filter_kernel_separable(%arg0: i32, %arg1: memref<16x130xf32, #tpu.memory_space<vmem>>, %arg2: memref<14x128xf32, #tpu.memory_space<vmem>>) attributes {dimension_semantics = [#tpu.dimension_semantics<arbitrary>], iteration_bounds = array<i64: 1>, scalar_prefetch = 0 : i64, scratch_operands = 0 : i64, tpu.core_type = #tpu.core_type<tc>, window_params = [{pipeline_mode = #tpu.pipeline_mode<synchronous>, transform_indices = @transform_0, window_bounds = array<i64: 16, 130>}, {pipeline_mode = #tpu.pipeline_mode<synchronous>, transform_indices = @transform_1, window_bounds = array<i64: 14, 128>}]} {
    %c0 = arith.constant 0 : index
    %c0_0 = arith.constant 0 : index
    %0 = vector.load %arg1[%c0, %c0_0] : memref<16x130xf32, #tpu.memory_space<vmem>>, vector<16x130xf32>
    %1 = vector.extract_strided_slice %0 {offsets = [0, 0], sizes = [16, 128], strides = [1, 1]} : vector<16x130xf32> to vector<16x128xf32>
    %cst = arith.constant -2.500000e-01 : f32
    %2 = vector.broadcast %cst : f32 to vector<16x128xf32>
    %3 = arith.mulf %2, %1 : vector<16x128xf32>
    %4 = vector.extract_strided_slice %0 {offsets = [0, 1], sizes = [16, 128], strides = [1, 1]} : vector<16x130xf32> to vector<16x128xf32>
    %cst_1 = arith.constant -5.000000e-01 : f32
    %5 = vector.broadcast %cst_1 : f32 to vector<16x128xf32>
    %6 = arith.mulf %5, %4 : vector<16x128xf32>
    %7 = arith.addf %3, %6 : vector<16x128xf32>
    %8 = vector.extract_strided_slice %0 {offsets = [0, 2], sizes = [16, 128], strides = [1, 1]} : vector<16x130xf32> to vector<16x128xf32>
    %cst_2 = arith.constant -2.500000e-01 : f32
    %9 = vector.broadcast %cst_2 : f32 to vector<16x128xf32>
    %10 = arith.mulf %9, %8 : vector<16x128xf32>
    %11 = arith.addf %7, %10 : vector<16x128xf32>
    %12 = vector.extract_strided_slice %11 {offsets = [0, 0], sizes = [14, 128], strides = [1, 1]} : vector<16x128xf32> to vector<14x128xf32>
    %cst_3 = arith.constant -2.500000e-01 : f32
    %13 = vector.broadcast %cst_3 : f32 to vector<14x128xf32>
    %14 = arith.mulf %13, %12 : vector<14x128xf32>
    %15 = vector.extract_strided_slice %11 {offsets = [1, 0], sizes = [14, 128], strides = [1, 1]} : vector<16x128xf32> to vector<14x128xf32>
    %cst_4 = arith.constant -5.000000e-01 : f32
    %16 = vector.broadcast %cst_4 : f32 to vector<14x128xf32>
    %17 = arith.mulf %16, %15 : vector<14x128xf32>
    %18 = arith.addf %14, %17 : vector<14x128xf32>
    %19 = vector.extract_strided_slice %11 {offsets = [2, 0], sizes = [14, 128], strides = [1, 1]} : vector<16x128xf32> to vector<14x128xf32>
    %cst_5 = arith.constant -2.500000e-01 : f32
    %20 = vector.broadcast %cst_5 : f32 to vector<14x128xf32>
    %21 = arith.mulf %20, %19 : vector<14x128xf32>
    %22 = arith.addf %18, %21 : vector<14x128xf32>
    %c0_6 = arith.constant 0 : index
    %c0_7 = arith.constant 0 : index
    %23 = vector.load %arg2[%c0_6, %c0_7] : memref<14x128xf32, #tpu.memory_space<vmem>>, vector<14x128xf32>
    tpu.vector_store %arg2[%c0_6, %c0_7], %22 {strides = array<i32>} : memref<14x128xf32, #tpu.memory_space<vmem>>, vector<14x128xf32>,
    return
  }
  func.func @transform_0(%arg0: i32) -> (i32, i32) {
    %c0_i32 = arith.constant 0 : i32
    %c0_i32_0 = arith.constant 0 : i32
    %c0_i32_1 = arith.constant 0 : i32
    return %c0_i32, %c0_i32_0 : i32, i32
  }
  func.func @transform_1(%arg0: i32) -> (i32, i32) {
    %c0_i32 = arith.constant 0 : i32
    %c0_i32_0 = arith.constant 0 : i32
    %c0_i32_1 = arith.constant 0 : i32
    return %c0_i32, %c0_i32_0 : i32, i32
  }
}

</mosaic_0001>

<bundles_post_ra>
// kernel: tpu_custom_call.1
= control target key start
LH: loop header
LB: loop body
LE: loop exit
PB: predicated region body
PF: predicated region fallthrough
CT: control target
= control target key end

     0   :  { %6 = vsyncpa [#allocation3], 0  ;;  %s192_s0 = inlined_call_operand.hbm [shape: f32[16,130], index: 0, kind: input, shape index: {}]   ;;  %s193_s1 = inlined_call_operand.hbm [shape: f32[14,128], index: 1, kind: output, shape index: {}]  }
   0x1   :  { %7 = vsyncpa [#allocation4], 0  ;;  %s168_s6 = smov [#allocation2]  }
   0x2   :  { %s13_s7 = sshll.u32 %s168_s6, 4  ;;  %s14_s7 = int_to_ptr.vmem [resolvable:$true] %s13_s7 }
   0x3   :  { %s132_s8 = scalar_lea.vmem %s14_s7, 512  ;;  %p137_p1 = scmp.lt.s32.totalorder %s14_s7, %s14_s7 }
   0x4   :  { %p133_p0 = scmp.ne.s32.totalorder %s14_s7, %s132_s8  ;;  %p138_p2 = scmp.lt.s32.totalorder %s132_s8, %s132_s8 }
   0x6   :  { %p139_p3 = por %p138_p2, %p137_p1 }
   0x8   :  { %p140_p4 = pnand %p139_p3, %p133_p0 }
   0xa   :  { %143 = shalt.err (!%p140_p4)
}
   0xb   :  { %s169_s9 = smov 256   ;;  %s170_s10 = smov 16  }
   0xc   :  { %19 = dma.hbm_to_vmem [thread:$0]  %s192_s0, 512, %s14_s7, [#allocation3], %s169_s9, %s169_s9, %s170_s10  }
   0xd   :  { %164 = dma.done.wait [#allocation3], 512  }
   0xe   :  { %165 = vsyncadd [#allocation3], 4294966784  ;;  %v25_v0 = vld [vmem:[#allocation2 + $0x10] sm:$0xff]  ;;  %v23_v1 = vld [vmem:[#allocation2] sm:$0xff]  ;;  %s171_s13 = smov 127   ;;  %s172_s14 = smov 126  }
   0xf   :  { %v26_v2 = vld [vmem:[#allocation2 + $0x18] sm:$0xff]  ;;  %v31_v3 = vmul.f32 -0.5, %v25_v0  ;;  %v29_v4 = vmul.f32 -0.5, %v23_v1  ;;  %v24_v5 = vld [vmem:[#allocation2 + $0x8] sm:$0xff]  ;;  %v27_v8 = vmul.f32 -0.25, %v23_v1  ;;  %v28_v10 = vmul.f32 -0.25, %v25_v0 }
  0x10   :  { %v32_v6 = vmul.f32 -0.5, %v26_v2  ;;  %v30_v7 = vmul.f32 -0.5, %v24_v5  ;;  %v52_v9 = vmul.f32 -0.25, %v24_v5  ;;  %v53_v11 = vmul.f32 -0.25, %v26_v2  ;;  %s173_s0 = smov [#allocation5]  }
  0x11   :  { %41 = vrot.lane.b32.xlu1 %v31_v3, %s171_s13  ;;  %37 = vrot.lane.b32.xlu0 %v29_v4, %s171_s13  ;;  %vm45_vm0 = vcmask 1039360   ;;  %vm66_vm1 = vcmask 1031168   ;;  %vm79_vm2 = vcmask 1046528   ;;  %vm89_vm3 = vcmask 1045504   ;;  %s104_s15 = sshll.u32 %s173_s0, 4  ;;  %s105_s15 = int_to_ptr.vmem [resolvable:$true] %s104_s15 }
  0x12   :  { %s144_s16 = scalar_lea.vmem %s105_s15, 256  ;;  %p149_p6 = scmp.lt.s32.totalorder %s105_s15, %s105_s15 }
  0x13   :  { %p145_p5 = scmp.ne.s32.totalorder %s105_s15, %s144_s16  ;;  %p150_p7 = scmp.lt.s32.totalorder %s144_s16, %s144_s16 }
  0x15   :  { %43 = vrot.lane.b32.xlu1 %v32_v6, %s171_s13  ;;  %39 = vrot.lane.b32.xlu0 %v30_v7, %s171_s13  ;;  %p151_p8 = por %p150_p7, %p149_p6 }
  0x17   :  { %p152_p9 = pnand %p151_p8, %p145_p5 }
  0x19   :  { %60 = vrot.lane.b32.xlu1 %v52_v9, %s172_s14  ;;  %58 = vrot.lane.b32.xlu0 %v27_v8, %s172_s14 }
  0x1d   :  { %64 = vrot.lane.b32.xlu1 %v53_v11, %s172_s14  ;;  %62 = vrot.lane.b32.xlu0 %v28_v10, %s172_s14 }
  0x83   :  { %v42_v12 = vpop.permute.xlu1 %41  ;;  %v38_v13 = vpop.permute.xlu0 %37 }
  0x87   :  { %v44_v14 = vpop.permute.xlu1 %43  ;;  %v40_v15 = vpop.permute.xlu0 %39 }
  0x88   :  { %v46_v16 = vsel %vm45_vm0, %v38_v13, %v40_v15  ;;  %v47_v20 = vsel %vm45_vm0, %v42_v12, %v44_v14 }
  0x89   :  { %v50_v17 = vadd.f32 %v46_v16, %v27_v8  ;;  %v51_v23 = vadd.f32 %v47_v20, %v28_v10 }
  0x8b   :  { %v61_v18 = vpop.permute.xlu1 %60  ;;  %v59_v19 = vpop.permute.xlu0 %58 }
  0x8c   :  { %v67_v21 = vsel %vm66_vm1, %v59_v19, %v61_v18 }
  0x8d   :  { %v71_v22 = vadd.f32 %v67_v21, %v50_v17 }
  0x8f   :  { %v65_v24 = vpop.permute.xlu1 %64  ;;  %v63_v25 = vpop.permute.xlu0 %62  ;;  %v75_v27 = vmul.f32 -0.5, %v71_v22  ;;  %v73_v29 = vmul.f32 -0.25, %v71_v22 }
  0x90   :  { %v68_v26 = vsel %vm66_vm1, %v63_v25, %v65_v24 }
  0x91   :  { %v72_v28 = vadd.f32 %v68_v26, %v51_v23  ;;  %v80_v32 = vrot.slane %v75_v27, 1  ;;  %v90_v35 = vrot.slane %v73_v29, 2 }
  0x93   :  { %v74_v30 = vmul.f32 -0.25, %v72_v28  ;;  %v76_v31 = vmul.f32 -0.5, %v72_v28 }
  0x95   :  { %v81_v33 = vrot.slane %v76_v31, 1  ;;  %v91_v34 = vrot.slane %v74_v30, 2 }
  0x97   :  { %v82_v36 = vsel %vm79_vm2, %v80_v32, %v81_v33  ;;  %v86_v37 = vadd.f32 %v81_v33, %v74_v30  ;;  %v92_v39 = vsel %vm89_vm3, %v90_v35, %v91_v34 }
  0x98   :  { %v85_v38 = vadd.f32 %v82_v36, %v73_v29 }
  0x99   :  { %v96_v40 = vadd.f32 %v91_v34, %v86_v37 }
  0x9a   :  { %v95_v41 = vadd.f32 %v92_v39, %v85_v38 }
  0x9b   :  { %98 = vst [vmem:[#allocation5 + $0x8] sm:$0x3f] %v96_v40 }
  0x9c   :  { %97 = vst [vmem:[#allocation5] sm:$0xff] %v95_v41 }
  0x9d   :  { %155 = shalt.err (!%p152_p9)
}
  0x9e   :  { %s174_s17 = smov 128   ;;  %s175_s18 = smov 8  }
  0x9f   :  { %110 = dma.vmem_to_hbm [thread:$0]  %s105_s15, 256, %s193_s1, [#allocation4], %s174_s17, %s174_s17, %s175_s18  }
  0xa0   :  { %166 = dma.done.wait [#allocation4], 256  }
  0xa1   :  { %167 = vsyncadd [#allocation4], 4294967040 }
  0xa2   :  { %114 = vsyncpa [#allocation3], 1 }
  0xa3   :  { %115 = vsyncpa [#allocation4], 1 }

</bundles_post_ra>
